<compile_context>
chip_gen: v5e
topology: v5e:2x2
jax: 0.10.0
libtpu: 0.0.40
codegen_flags: <defaults>
</compile_context>

<pallas_src>
import functools

import jax
import jax.numpy as jnp
from jax.experimental import pallas as pl
from jax.experimental.pallas import tpu as pltpu

LANE = 128


def _round_up(n, m):
    return ((n + m - 1) // m) * m


def _make_kernel(n_half: int):
    """out = mu + exp(0.5*log_var + ln(scale)) * eps, fused single-matmul form."""

    def kernel(x_ref, w_ref, b_ref, eps_ref, o_ref):
        # One MXU push: cols [0, n_half) -> mu, [n_half, 2*n_half) -> 0.5*log_var + ln(scale).
        y = jnp.dot(x_ref[...], w_ref[...],
                    preferred_element_type=jnp.float32) + b_ref[...]
        mu = y[:, :n_half]
        half_logv = y[:, n_half:]          # 0.5 and ln(scale) folded in at prep time

        eps = eps_ref[...].astype(jnp.float32)

        # Lane-dense (multiple-of-128 columns) unmasked store.
        o_ref[...] = (mu + jnp.exp(half_logv) * eps).astype(o_ref.dtype)

    return kernel


def prepare_params(w_mean, b_mean, w_logvar, b_logvar, *, scale, lane=LANE):
    """One-time weight prep: fuse mean/log-var linears into a lane-padded slab.

    Returns W_cat (I, 2*n_half) in bf16 and b_cat (1, 2*n_half) in f32.  The
    log-var half is pre-scaled by 0.5 and ln(scale) is folded into its bias, so
    the kernel needs no extra full-tile multiplies.  Padded log-var bias lanes
    are -30 so padded output columns come out ~0.
    """
    I, O = w_mean.shape
    n_half = _round_up(O, lane)

    def pad_cols(a, value=0.0):
        return jnp.pad(a, ((0, 0), (0, n_half - a.shape[-1])), constant_values=value)

    log_scale = jnp.log(jnp.float32(scale))
    w_cat = jnp.concatenate([pad_cols(w_mean), pad_cols(0.5 * w_logvar)], axis=1)
    b_cat = jnp.concatenate(
        [pad_cols(jnp.asarray(b_mean).reshape(1, -1)),
         pad_cols(0.5 * jnp.asarray(b_logvar).reshape(1, -1) + log_scale, value=-30.0)],
        axis=1)
    # bf16 weights: MXU-native rate and half the HBM/VMEM footprint.  Bias stays
    # f32 (tiny, added post-accumulation).
    return w_cat.astype(jnp.bfloat16), b_cat.astype(jnp.float32), n_half


@functools.partial(jax.jit, static_argnames=("out_features", "batch_tile"))
def lambda_forward(x, w_cat, b_cat, noise_key, *, out_features, batch_tile=512):
    """x: (B, I) f32; w_cat: (I, 2*n_half) bf16; b_cat: (1, 2*n_half) f32."""
    B, I = x.shape
    n_cat = w_cat.shape[1]
    n_half = n_cat // 2

    # --- batch tiling: tight padding (<8 rows/tile), and >=2 grid steps when the
    # batch allows so the "parallel" axis actually feeds both v7x TensorCores.
    num_tiles = pl.cdiv(B, batch_tile)
    if num_tiles < 2 and B >= 16:
        num_tiles = 2
    tb = _round_up(pl.cdiv(B, num_tiles), 8)
    b_pad = num_tiles * tb

    x_bf = x.astype(jnp.bfloat16)
    if b_pad != B:
        x_bf = jnp.pad(x_bf, ((0, b_pad - B), (0, 0)))

    # Noise drawn in the wrapper (bf16 halves its HBM stream into the kernel).
    # TODO(synk): switch to on-device pltpu.prng_seed/stateful_normal once the
    # target runtime lowers those primitives (would remove this HBM read).
    eps = jax.random.normal(noise_key, (b_pad, n_half), dtype=jnp.bfloat16)

    # Explicit VMEM budget: double-buffered x/eps/out tiles + resident weights.
    vmem_bytes = (2 * tb * I * 2            # x tiles (bf16, double-buffered)
                  + 2 * tb * n_half * 2     # eps tiles (bf16)
                  + 2 * tb * n_half * 4     # out tiles (f32)
                  + 2 * I * n_cat * 2       # W_cat copies (bf16)
                  + 2 * n_cat * 4)          # b_cat copies (f32)
    vmem_limit = int(min(max(2 * vmem_bytes + (4 << 20), 8 << 20), 96 << 20))

    out = pl.pallas_call(
        _make_kernel(n_half),
        out_shape=jax.ShapeDtypeStruct((b_pad, n_half), jnp.float32),
        grid_spec=pltpu.PrefetchScalarGridSpec(
            num_scalar_prefetch=0,
            grid=(num_tiles,),
            in_specs=[
                pl.BlockSpec((tb, I), lambda i: (i, 0)),          # x (tiled)
                # TODO(synk): pl.Buffered(1) on the two resident operands would
                # halve their VMEM; left at default buffering for compatibility.
                pl.BlockSpec((I, n_cat), lambda i: (0, 0)),       # W_cat (resident)
                pl.BlockSpec((1, n_cat), lambda i: (0, 0)),       # b_cat (resident)
                pl.BlockSpec((tb, n_half), lambda i: (i, 0)),     # eps (tiled)
            ],
            out_specs=pl.BlockSpec((tb, n_half), lambda i: (i, 0)),  # lane-dense out
        ),
        compiler_params=pltpu.CompilerParams(
            dimension_semantics=("parallel",),   # shard batch tiles across TCs
            vmem_limit_bytes=vmem_limit,
        ),
    )(x_bf, w_cat, b_cat, eps)

    # Strip batch/lane padding outside the kernel (keeps in-kernel stores unmasked).
    return out[:B, :out_features], eps[:B, :out_features].astype(jnp.float32)


if __name__ == "__main__":
    # Small shapes consistent with the module: Lambda(i=32, o=16), batch=8.
    B, I, O = 8, 32, 16
    scale = 1e-3

    key = jax.random.PRNGKey(0)
    kx, kwm, kbm, kwv, kbv, keps = jax.random.split(key, 6)

    # Deterministic parameter init (mimics nn.Linear uniform(-1/sqrt(I), 1/sqrt(I))).
    bound = 1.0 / jnp.sqrt(jnp.float32(I))
    x = jax.random.normal(kx, (B, I), dtype=jnp.float32)
    w_mean = jax.random.uniform(kwm, (I, O), minval=-bound, maxval=bound, dtype=jnp.float32)
    b_mean = jax.random.uniform(kbm, (1, O), minval=-bound, maxval=bound, dtype=jnp.float32)
    w_logvar = jax.random.uniform(kwv, (I, O), minval=-bound, maxval=bound, dtype=jnp.float32)
    b_logvar = jax.random.uniform(kbv, (1, O), minval=-bound, maxval=bound, dtype=jnp.float32)

    # One-time parameter preparation: fuse, fold 0.5 and ln(scale), pad, cast bf16.
    w_cat, b_cat, _ = prepare_params(w_mean, b_mean, w_logvar, b_logvar, scale=scale)

    out, eps = lambda_forward(x, w_cat, b_cat, keps, out_features=O)
    out, eps = jax.block_until_ready((out, eps))

    # Pure-JAX reference using the exact same bf16 operands and the drawn noise.
    x_bf = x.astype(jnp.bfloat16)
    mu_ref = jnp.dot(x_bf, w_mean.astype(jnp.bfloat16),
                     preferred_element_type=jnp.float32) + b_mean
    half_logv_ref = (jnp.dot(x_bf, (0.5 * w_logvar).astype(jnp.bfloat16),
                             preferred_element_type=jnp.float32)
                     + 0.5 * b_logvar + jnp.log(jnp.float32(scale)))
    ref = mu_ref + jnp.exp(half_logv_ref) * eps

    assert out.shape == (B, O) and eps.shape == (B, O)
    assert bool(jnp.all(jnp.isfinite(out))) and bool(jnp.all(jnp.isfinite(eps)))
    assert jnp.allclose(out, ref, atol=1e-4, rtol=1e-4), \
        f"max abs err {float(jnp.max(jnp.abs(out - ref)))}"
    # Light sanity on the noise (B*O = 128 samples): roughly standard normal.
    assert abs(float(eps.mean())) < 0.5 and 0.4 < float(eps.std()) < 1.8

    print("KERNEL_OK")
</pallas_src>

<mosaic_0001>
module attributes {stable_mosaic.version = 11 : i64} {
  func.func @kernel(%arg0: i32, %arg1: memref<8x32xbf16, #tpu.memory_space<vmem>>, %arg2: memref<32x256xbf16, #tpu.memory_space<vmem>>, %arg3: memref<1x256xf32, #tpu.memory_space<vmem>>, %arg4: memref<8x128xbf16, #tpu.memory_space<vmem>>, %arg5: memref<8x128xf32, #tpu.memory_space<vmem>>) attributes {dimension_semantics = [#tpu.dimension_semantics<parallel>], iteration_bounds = array<i64: 1>, scalar_prefetch = 0 : i64, scratch_operands = 0 : i64, tpu.core_type = #tpu.core_type<tc>, window_params = [{transform_indices = @transform_0, window_bounds = array<i64: 8, 32>}, {pipeline_mode = #tpu.pipeline_mode<synchronous>, transform_indices = @transform_1, window_bounds = array<i64: 32, 256>}, {pipeline_mode = #tpu.pipeline_mode<synchronous>, transform_indices = @transform_2, window_bounds = array<i64: 1, 256>}, {transform_indices = @transform_3, window_bounds = array<i64: 8, 128>}, {transform_indices = @transform_4, window_bounds = array<i64: 8, 128>}]} {
    %c0 = arith.constant 0 : index
    %c0_0 = arith.constant 0 : index
    %0 = vector.load %arg1[%c0, %c0_0] : memref<8x32xbf16, #tpu.memory_space<vmem>>, vector<8x32xbf16>
    %c0_1 = arith.constant 0 : index
    %c0_2 = arith.constant 0 : index
    %1 = vector.load %arg2[%c0_1, %c0_2] : memref<32x256xbf16, #tpu.memory_space<vmem>>, vector<32x256xbf16>
    %cst = arith.constant dense<0.000000e+00> : vector<8x256xf32>
    %2 = tpu.matmul %0, %1, %cst {dimension_numbers = #tpu.dot_dimension_numbers<[1], [0], [0], [1], [0, 0, 1, 1], [], []>} : vector<8x32xbf16>, vector<32x256xbf16>, vector<8x256xf32> -> vector<8x256xf32>
    %c0_3 = arith.constant 0 : index
    %c0_4 = arith.constant 0 : index
    %3 = vector.load %arg3[%c0_3, %c0_4] : memref<1x256xf32, #tpu.memory_space<vmem>>, vector<1x256xf32>
    %4 = vector.broadcast %3 : vector<1x256xf32> to vector<8x256xf32>
    %5 = arith.addf %2, %4 : vector<8x256xf32>
    %6 = vector.extract_strided_slice %5 {offsets = [0, 0], sizes = [8, 128], strides = [1, 1]} : vector<8x256xf32> to vector<8x128xf32>
    %7 = vector.extract_strided_slice %5 {offsets = [0, 128], sizes = [8, 128], strides = [1, 1]} : vector<8x256xf32> to vector<8x128xf32>
    %c0_5 = arith.constant 0 : index
    %c0_6 = arith.constant 0 : index
    %8 = vector.load %arg4[%c0_5, %c0_6] : memref<8x128xbf16, #tpu.memory_space<vmem>>, vector<8x128xbf16>
    %9 = arith.extf %8 : vector<8x128xbf16> to vector<8x128xf32>
    %10 = math.exp %7 : vector<8x128xf32>
    %11 = arith.mulf %10, %9 : vector<8x128xf32>
    %12 = arith.addf %6, %11 : vector<8x128xf32>
    %c0_7 = arith.constant 0 : index
    %c0_8 = arith.constant 0 : index
    %13 = vector.load %arg5[%c0_7, %c0_8] : memref<8x128xf32, #tpu.memory_space<vmem>>, vector<8x128xf32>
    tpu.vector_store %arg5[%c0_7, %c0_8], %12 {strides = array<i32>} : memref<8x128xf32, #tpu.memory_space<vmem>>, vector<8x128xf32>,
    return
  }
  func.func @transform_0(%arg0: i32) -> (i32, i32) {
    %c0_i32 = arith.constant 0 : i32
    %c0_i32_0 = arith.constant 0 : i32
    return %arg0, %c0_i32 : i32, i32
  }
  func.func @transform_1(%arg0: i32) -> (i32, i32) {
    %c0_i32 = arith.constant 0 : i32
    %c0_i32_0 = arith.constant 0 : i32
    %c0_i32_1 = arith.constant 0 : i32
    return %c0_i32, %c0_i32_0 : i32, i32
  }
  func.func @transform_2(%arg0: i32) -> (i32, i32) {
    %c0_i32 = arith.constant 0 : i32
    %c0_i32_0 = arith.constant 0 : i32
    %c0_i32_1 = arith.constant 0 : i32
    return %c0_i32, %c0_i32_0 : i32, i32
  }
  func.func @transform_3(%arg0: i32) -> (i32, i32) {
    %c0_i32 = arith.constant 0 : i32
    %c0_i32_0 = arith.constant 0 : i32
    return %arg0, %c0_i32 : i32, i32
  }
  func.func @transform_4(%arg0: i32) -> (i32, i32) {
    %c0_i32 = arith.constant 0 : i32
    %c0_i32_0 = arith.constant 0 : i32
    return %arg0, %c0_i32 : i32, i32
  }
}

</mosaic_0001>

<bundles_post_ra>
// kernel: lambda_forward.1
= control target key start
LH: loop header
LB: loop body
LE: loop exit
PB: predicated region body
PF: predicated region fallthrough
CT: control target
= control target key end

     0   :  { %9 = vsyncpa [#allocation3], 0  ;;  %s244_s0 = inlined_call_operand.vmem [shape: bf16[8,32], index: 0, kind: input, shape index: {}]   ;;  %s245_s1 = inlined_call_operand.hbm [shape: bf16[32,256], index: 1, kind: input, shape index: {}]   ;;  %s246_s2 = inlined_call_operand.vmem [shape: f32[1,256], index: 2, kind: input, shape index: {}]   ;;  %s247_s3 = inlined_call_operand.vmem [shape: bf16[8,128], index: 3, kind: input, shape index: {}]   ;;  %s248_s4 = inlined_call_operand.hbm [shape: f32[8,128], index: 4, kind: output, shape index: {}]  }
   0x1   :  { %10 = vsyncpa [#allocation4], 0  ;;  %s17_s17 = sshll.u32 %s245_s1, 4  ;;  %s200_s18 = smov [#allocation2]   ;;  %s18_s17 = int_to_ptr.hbm [resolvable:$true] %s17_s17 }
   0x2   :  { %s19_s19 = sshll.u32 %s200_s18, 4  ;;  %s201_s20 = smov 128   ;;  %s20_s19 = int_to_ptr.vmem [resolvable:$true] %s19_s19 }
   0x3   :  { %s202_s21 = smov 8  }
   0x4   :  { %25 = dma.hbm_to_vmem [thread:$0]  %s18_s17, 512, %s20_s19, [#allocation3], %s201_s20, %s201_s20, %s202_s21  }
   0x5   :  { %196 = dma.done.wait [#allocation3], 512  }
   0x6   :  { %197 = vsyncadd [#allocation3], 4294966784  ;;  %v140_v0 = vld [vmem:[#allocation2 + $0x14] sm:$0xf]  ;;  %v132_v1 = vld [vmem:[#allocation2 + $0x18] sm:$0xf0] }
   0x7   :  { %v130_v2 = vld [vmem:[#allocation2 + $0x10] sm:$0xf]  ;;  %v135_v3 = vor.u32 %v140_v0, %v132_v1  ;;  %v141_v4 = vld [vmem:[#allocation2 + $0x14] sm:$0xf0]  ;;  %v138_v5 = vld [vmem:[#allocation2 + $0x4] sm:$0xf] }
   0x8   :  { %v124_v6 = vld [vmem:[#allocation2 + $0x8] sm:$0xf0]  ;;  %v131_v7 = vor.u32 %v141_v4, %v130_v2  ;;  %v122_v8 = vld [vmem:[#allocation2] sm:$0xf]  ;;  %v139_v9 = vld [vmem:[#allocation2 + $0x4] sm:$0xf0] }
   0x9   :  { %89 = vmatpush.bf16.msra.mxu1 %v135_v3  ;;  %v127_v10 = vor.u32 %v138_v5, %v124_v6  ;;  %v123_v11 = vor.u32 %v139_v9, %v122_v8  ;;  %v35_v12 = vld [vmem:[%s244_s0] sm:$0xf]  ;;  %vm66_vm0 = vcmask 261120   ;;  %s203_s0 = smov [#allocation5]  }
   0xa   :  { %76 = vmatpush.bf16.msra.mxu0 %v131_v7  ;;  %v40_v13 = vld [vmem:[%s246_s2] sm:$0x3]  ;;  %s108_s27 = sshll.u32 %s203_s0, 4  ;;  %s110_s2 = sshll.u32 %s248_s4, 4  ;;  %s109_s27 = int_to_ptr.vmem [resolvable:$true] %s108_s27  ;;  %s111_s2 = int_to_ptr.hbm [resolvable:$true] %s110_s2 }
   0xb   :  { %v43_v14 = vperm.slane %v40_v13, 1  ;;  %v96_v19 = vld [vmem:[%s247_s3] sm:$0xf]  ;;  %v42_v20 = vperm.slane %v40_v13, 0 }
   0xc   :  { %v97_v21 = vunpack.c.l.bf16 %v96_v19 }
   0xd   :  { %90 = vmatpush.bf16.msra.mxu1 %v127_v10 }
   0xe   :  { %77 = vmatpush.bf16.msra.mxu0 %v123_v11 }
  0x10   :  { %137 = vmatmul.msk.bf16.vlgmr.msra.gmra.mxu1 %vm66_vm0, %v35_v12 }
  0x11   :  { %136 = vmatmul.msk.bf16.vlgmr.msra.gmra.mxu0 %vm66_vm0, %v35_v12 }
  0x8d   :  { %v92_v15 = vpop.f32.mrf.mxu1 }
  0x8e   :  { %v93_v16 = vadd.f32 %v92_v15, %v43_v14  ;;  %v79_v17 = vpop.f32.mrf.mxu0 }
  0x8f   :  { %v80_v25 = vadd.f32 %v79_v17, %v42_v20 }
  0x90   :  { %v98_v18 = vmul.f32 1.442695, %v93_v16 }
  0x92   :  { %146 = vpow2.f32 %v98_v18 }
  0x95   :  { %v94_v22 = vpop.f32.mrf.mxu1 }
  0x96   :  { %v81_v23 = vpop.f32.mrf.mxu0 }
  0x98   :  { %v147_v24 = vpop.eup %146 }
  0x99   :  { %v100_v26 = vmul.f32 %v147_v24, %v97_v21 }
  0x9b   :  { %v101_v27 = vadd.f32 %v100_v26, %v80_v25 }
  0x9d   :  { %102 = vst [vmem:[#allocation5] sm:$0xff] %v101_v27 }
  0x9e   :  { %113 = dma.vmem_to_hbm [thread:$0]  %s109_s27, 128, %s111_s2, [#allocation4]  }
  0x9f   :  { %198 = dma.done.wait [#allocation4], 128  }
  0xa0   :  { %199 = vsyncadd [#allocation4], 4294967168 }
  0xa1   :  { %118 = vsyncpa [#allocation3], 1 }
  0xa2   :  { %119 = vsyncpa [#allocation4], 1 }

</bundles_post_ra>
